<compile_context>
chip_gen: v7x
topology: tpu7x:2x2x1
jax: 0.10.0
libtpu: 0.0.40
codegen_flags: <defaults>
</compile_context>

<pallas_src>
import jax
import jax.numpy as jnp
from jax.experimental import pallas as pl
from jax.experimental.pallas import tpu as pltpu

EPS = 1e-5

# Points per pass-1 grid step.  Toy problem: P=1024 -> 4 pipelined tiles.
# Real FCGF sizes: ~1024-2048 rows on v5e/v6e (128 MiB VMEM); roughly half that
# on v7x (64 MiB VMEM, 32 MiB default scoped) to keep double-buffering alive.
TILE_P = 256


# ----------------------------- Pallas kernels --------------------------------
def _conv_stats_kernel(cols_ref, w_ref, conv_ref, stats_ref):
    """Deep-K conv matmul + per-tile partial BN statistics.

    cols_ref : (TILE_P, KC_pad)  bf16   im2col'd taps, lane-dense (216/256 live)
    w_ref    : (KC_pad, Cout)    bf16   flattened (K*Cin, Cout) weights
    conv_ref : (TILE_P, Cout)    f32    conv output tile
    stats_ref: (1, 2, Cout)      f32    [sum, sum_of_squares] for this tile
    """
    acc = jnp.dot(cols_ref[...], w_ref[...], preferred_element_type=jnp.float32)
    conv_ref[...] = acc
    s = jnp.sum(acc, axis=0, keepdims=True)
    ss = jnp.sum(acc * acc, axis=0, keepdims=True)
    stats_ref[...] = jnp.concatenate([s, ss], axis=0)[None]


def _bn_relu_kernel(conv_ref, scale_ref, shift_ref, out_ref):
    """Lane-packed BN affine + ReLU (no residual)."""
    y = conv_ref[...] * scale_ref[...] + shift_ref[...]
    out_ref[...] = jnp.maximum(y, 0.0).astype(out_ref.dtype)


def _bn_relu_res_kernel(conv_ref, scale_ref, shift_ref, res_ref, out_ref):
    """Lane-packed BN affine + residual + ReLU."""
    y = conv_ref[...] * scale_ref[...] + shift_ref[...] + res_ref[...]
    out_ref[...] = jnp.maximum(y, 0.0).astype(out_ref.dtype)


# ----------------------------- pallas_call wrappers ---------------------------
def _conv_stats_call(cols, w_flat, cout):
    p_pad, kc_pad = cols.shape
    n_tiles = p_pad // TILE_P
    return pl.pallas_call(
        _conv_stats_kernel,
        out_shape=(
            jax.ShapeDtypeStruct((p_pad, cout), jnp.float32),
            jax.ShapeDtypeStruct((n_tiles, 2, cout), jnp.float32),
        ),
        grid_spec=pltpu.PrefetchScalarGridSpec(
            num_scalar_prefetch=0,
            grid=(n_tiles,),
            in_specs=[
                pl.BlockSpec((TILE_P, kc_pad), lambda i: (i, 0)),
                pl.BlockSpec((kc_pad, cout), lambda i: (0, 0)),
            ],
            out_specs=[
                pl.BlockSpec((TILE_P, cout), lambda i: (i, 0)),
                pl.BlockSpec((1, 2, cout), lambda i: (i, 0, 0)),
            ],
        ),
        compiler_params=pltpu.CompilerParams(
            dimension_semantics=("parallel",),
            vmem_limit_bytes=32 * 1024 * 1024,
        ),
    )(cols, w_flat)


def _bn_act_call(conv_pk, scale_pk, shift_pk, res_pk, out_dtype, tile_rows):
    rows, lanes = conv_pk.shape
    n_tiles = rows // tile_rows
    in_specs = [
        pl.BlockSpec((tile_rows, lanes), lambda i: (i, 0)),
        pl.BlockSpec((1, lanes), lambda i: (0, 0)),
        pl.BlockSpec((1, lanes), lambda i: (0, 0)),
    ]
    args = [conv_pk, scale_pk, shift_pk]
    if res_pk is not None:
        in_specs.append(pl.BlockSpec((tile_rows, lanes), lambda i: (i, 0)))
        args.append(res_pk)
        kernel = _bn_relu_res_kernel
    else:
        kernel = _bn_relu_kernel
    return pl.pallas_call(
        kernel,
        out_shape=jax.ShapeDtypeStruct((rows, lanes), out_dtype),
        grid_spec=pltpu.PrefetchScalarGridSpec(
            num_scalar_prefetch=0,
            grid=(n_tiles,),
            in_specs=in_specs,
            out_specs=pl.BlockSpec((tile_rows, lanes), lambda i: (i, 0)),
        ),
        compiler_params=pltpu.CompilerParams(
            dimension_semantics=("parallel",),
            vmem_limit_bytes=32 * 1024 * 1024,
        ),
    )(*args)


# ------------------------------- JAX glue -------------------------------------
def _round_up(n, m):
    return ((n + m - 1) // m) * m


def _pad_axis(a, axis, target):
    pad = target - a.shape[axis]
    if pad <= 0:
        return a
    widths = [(0, 0)] * a.ndim
    widths[axis] = (0, pad)
    return jnp.pad(a, widths)


def im2col_3d(x):
    """(N, D, H, W, C) -> (N*D*H*W, 27*C), zero 'same' padding.

    Tap order k = kd*9 + kh*3 + kw, channel-minor — matches
    w.reshape(27*Cin, Cout) with the Minkowski (K, Cin, Cout) weight layout.
    """
    n, d, h, w, c = x.shape
    xp = jnp.pad(x, ((0, 0), (1, 1), (1, 1), (1, 1), (0, 0)))
    taps = []
    for kd in range(3):
        for kh in range(3):
            for kw in range(3):
                taps.append(xp[:, kd:kd + d, kh:kh + h, kw:kw + w, :])
    cols = jnp.stack(taps, axis=4)                 # (N, D, H, W, 27, C)
    return cols.reshape(n * d * h * w, 27 * c)


def basic_block_forward(x, params):
    """x: (N, D, H, W, C) dense voxel features (f32). Returns the same shape."""
    n, d, h, w, cin = x.shape
    cout = params["w1"].shape[-1]
    assert cin == cout, "downsample=None requires inplanes == planes"
    p = n * d * h * w

    # Lane-packing factor for the elementwise pass (16 points/row at Cout=8).
    pack = 128 // cout if 128 % cout == 0 else 1
    lanes = pack * cout
    assert TILE_P % pack == 0
    tile_rows = TILE_P // pack
    p_pad = _round_up(p, TILE_P)
    n_rows = p_pad // pack

    def conv_bn_affine(feats_bf16, w_kco, gamma, beta):
        # Lane-dense im2col feeding one deep matmul (bf16 stream, f32 accum).
        cols = im2col_3d(feats_bf16)                        # (p, 27*c) bf16
        kc_pad = _round_up(cols.shape[1], 128)
        cols = _pad_axis(_pad_axis(cols, 1, kc_pad), 0, p_pad)
        w_flat = _pad_axis(w_kco.reshape(-1, cout).astype(jnp.bfloat16), 0, kc_pad)
        conv_out, stats = _conv_stats_call(cols, w_flat, cout)
        # Tiny cross-tile reduction -> tiling-safe two-pass BN (biased variance).
        sums = jnp.sum(stats, axis=0)                       # (2, cout)
        mean = sums[0] / p
        var = jnp.maximum(sums[1] / p - mean * mean, 0.0)   # E[x^2] - E[x]^2
        scale = gamma * jax.lax.rsqrt(var + EPS)
        shift = beta - mean * scale
        return conv_out, scale, shift

    # ---- conv1 -> BN1 -> ReLU  (no fake zeros residual stream) ----
    conv1, scale1, shift1 = conv_bn_affine(
        x.astype(jnp.bfloat16), params["w1"], params["g1"], params["b1"])
    h_pk = _bn_act_call(conv1.reshape(n_rows, lanes),
                        jnp.tile(scale1, pack).reshape(1, lanes),
                        jnp.tile(shift1, pack).reshape(1, lanes),
                        None, jnp.bfloat16, tile_rows)
    h_feats = h_pk.reshape(p_pad, cout)[:p].reshape(n, d, h, w, cout)

    # ---- conv2 -> BN2 -> +residual -> ReLU ----
    conv2, scale2, shift2 = conv_bn_affine(
        h_feats, params["w2"], params["g2"], params["b2"])
    res_pk = _pad_axis(x.reshape(p, cin).astype(jnp.float32),
                       0, p_pad).reshape(n_rows, lanes)
    out_pk = _bn_act_call(conv2.reshape(n_rows, lanes),
                          jnp.tile(scale2, pack).reshape(1, lanes),
                          jnp.tile(shift2, pack).reshape(1, lanes),
                          res_pk, jnp.float32, tile_rows)
    return out_pk.reshape(p_pad, cout)[:p].reshape(n, d, h, w, cout)


# ----------------------------- reference (JAX) --------------------------------
def _ref_forward(x, params, eps=EPS, conv_dtype=None):
    """Dense-grid reference: relu(BN2(conv2(relu(BN1(conv1(x))))) + x) with
    training-mode (batch-stat, biased-variance) BN and 'same' zero padding.
    conv_dtype=bf16 rounds the conv inputs exactly like the Pallas data path
    (isolates structural correctness from the bf16 streaming precision)."""
    def q(a):
        return a.astype(conv_dtype).astype(jnp.float32) if conv_dtype is not None else a

    def conv(feats, w_kco):
        cin, cout = w_kco.shape[-2], w_kco.shape[-1]
        wk = w_kco.reshape(3, 3, 3, cin, cout)
        return jax.lax.conv_general_dilated(
            q(feats), q(wk), window_strides=(1, 1, 1), padding="SAME",
            dimension_numbers=("NDHWC", "DHWIO", "NDHWC"),
            precision=jax.lax.Precision.HIGHEST)

    def bn(y, g, b):
        m = jnp.mean(y, axis=(0, 1, 2, 3), keepdims=True)
        v = jnp.mean(jnp.square(y - m), axis=(0, 1, 2, 3), keepdims=True)
        return (y - m) * jax.lax.rsqrt(v + eps) * g + b

    h = jnp.maximum(bn(conv(x, params["w1"]), params["g1"], params["b1"]), 0.0)
    o = bn(conv(h, params["w2"]), params["g2"], params["b2"]) + x
    return jnp.maximum(o, 0.0)


# --------------------------------- main ----------------------------------------
if __name__ == "__main__":
    n, d, h, w = 2, 8, 8, 8
    inplanes = planes = 8
    k_vol = 27  # 3**3 kernel volume

    key = jax.random.PRNGKey(0)
    kx, kw1, kw2, kg1, kb1, kg2, kb2 = jax.random.split(key, 7)

    x = jax.random.normal(kx, (n, d, h, w, inplanes), jnp.float32)
    params = {
        "w1": 0.1 * jax.random.normal(kw1, (k_vol, inplanes, planes), jnp.float32),
        "w2": 0.1 * jax.random.normal(kw2, (k_vol, planes, planes), jnp.float32),
        "g1": 1.0 + 0.1 * jax.random.normal(kg1, (planes,), jnp.float32),
        "b1": 0.1 * jax.random.normal(kb1, (planes,), jnp.float32),
        "g2": 1.0 + 0.1 * jax.random.normal(kg2, (planes,), jnp.float32),
        "b2": 0.1 * jax.random.normal(kb2, (planes,), jnp.float32),
    }

    out = jax.jit(basic_block_forward)(x, params)
    out = jax.block_until_ready(out)
    assert out.shape == (n, d, h, w, planes)

    # Structural check: reference with the same bf16 rounding of the conv inputs.
    ref_q = _ref_forward(x, params, conv_dtype=jnp.bfloat16)
    assert jnp.allclose(out, ref_q, rtol=1e-2, atol=1e-2), "mismatch vs bf16-input reference"
    # Sanity check vs pure-f32 module semantics (tolerance covers bf16 streaming).
    ref_f = _ref_forward(x, params)
    assert jnp.allclose(out, ref_f, rtol=5e-2, atol=5e-2), "mismatch vs f32 reference"

    print("KERNEL_OK")
</pallas_src>

<mosaic_0001>
module attributes {stable_mosaic.version = 11 : i64} {
  func.func @_conv_stats_kernel(%arg0: i32, %arg1: memref<256x256xbf16, #tpu.memory_space<vmem>>, %arg2: memref<256x8xbf16, #tpu.memory_space<vmem>>, %arg3: memref<256x8xf32, #tpu.memory_space<vmem>>, %arg4: memref<1x2x8xf32, #tpu.memory_space<vmem>>) attributes {dimension_semantics = [#tpu.dimension_semantics<parallel>], iteration_bounds = array<i64: 4>, scalar_prefetch = 0 : i64, scratch_operands = 0 : i64, tpu.core_type = #tpu.core_type<tc>, window_params = [{transform_indices = @transform_0, window_bounds = array<i64: 256, 256>}, {pipeline_mode = #tpu.pipeline_mode<synchronous>, transform_indices = @transform_1, window_bounds = array<i64: 256, 8>}, {transform_indices = @transform_2, window_bounds = array<i64: 256, 8>}, {transform_indices = @transform_3, window_bounds = array<i64: 1, 2, 8>}]} {
    %c0 = arith.constant 0 : index
    %c0_0 = arith.constant 0 : index
    %0 = vector.load %arg1[%c0, %c0_0] : memref<256x256xbf16, #tpu.memory_space<vmem>>, vector<256x256xbf16>
    %c0_1 = arith.constant 0 : index
    %c0_2 = arith.constant 0 : index
    %1 = vector.load %arg2[%c0_1, %c0_2] : memref<256x8xbf16, #tpu.memory_space<vmem>>, vector<256x8xbf16>
    %cst = arith.constant dense<0.000000e+00> : vector<256x8xf32>
    %2 = tpu.matmul %0, %1, %cst {dimension_numbers = #tpu.dot_dimension_numbers<[1], [0], [0], [1], [0, 0, 1, 1], [], []>} : vector<256x256xbf16>, vector<256x8xbf16>, vector<256x8xf32> -> vector<256x8xf32>
    %c0_3 = arith.constant 0 : index
    %c0_4 = arith.constant 0 : index
    %3 = vector.load %arg3[%c0_3, %c0_4] : memref<256x8xf32, #tpu.memory_space<vmem>>, vector<256x8xf32>
    tpu.vector_store %arg3[%c0_3, %c0_4], %2 {strides = array<i32>} : memref<256x8xf32, #tpu.memory_space<vmem>>, vector<256x8xf32>,
    %cst_5 = arith.constant dense<0.000000e+00> : vector<8xf32>
    %4 = vector.multi_reduction <add>, %2, %cst_5 [0] : vector<256x8xf32> to vector<8xf32>
    %5 = vector.shape_cast %4 : vector<8xf32> to vector<1x8xf32>
    %6 = arith.mulf %2, %2 : vector<256x8xf32>
    %cst_6 = arith.constant dense<0.000000e+00> : vector<8xf32>
    %7 = vector.multi_reduction <add>, %6, %cst_6 [0] : vector<256x8xf32> to vector<8xf32>
    %8 = vector.shape_cast %7 : vector<8xf32> to vector<1x8xf32>
    %9 = tpu.concatenate %5, %8 in 0 : vector<1x8xf32>, vector<1x8xf32> -> vector<2x8xf32>
    %10 = vector.shape_cast %9 : vector<2x8xf32> to vector<1x2x8xf32>
    %c0_7 = arith.constant 0 : index
    %c0_8 = arith.constant 0 : index
    %c0_9 = arith.constant 0 : index
    %11 = vector.load %arg4[%c0_7, %c0_8, %c0_9] : memref<1x2x8xf32, #tpu.memory_space<vmem>>, vector<1x2x8xf32>
    tpu.vector_store %arg4[%c0_7, %c0_8, %c0_9], %10 {strides = array<i32>} : memref<1x2x8xf32, #tpu.memory_space<vmem>>, vector<1x2x8xf32>,
    return
  }
  func.func @transform_0(%arg0: i32) -> (i32, i32) {
    %c0_i32 = arith.constant 0 : i32
    %c0_i32_0 = arith.constant 0 : i32
    return %arg0, %c0_i32 : i32, i32
  }
  func.func @transform_1(%arg0: i32) -> (i32, i32) {
    %c0_i32 = arith.constant 0 : i32
    %c0_i32_0 = arith.constant 0 : i32
    %c0_i32_1 = arith.constant 0 : i32
    return %c0_i32, %c0_i32_0 : i32, i32
  }
  func.func @transform_2(%arg0: i32) -> (i32, i32) {
    %c0_i32 = arith.constant 0 : i32
    %c0_i32_0 = arith.constant 0 : i32
    return %arg0, %c0_i32 : i32, i32
  }
  func.func @transform_3(%arg0: i32) -> (i32, i32, i32) {
    %c0_i32 = arith.constant 0 : i32
    %c0_i32_0 = arith.constant 0 : i32
    %c0_i32_1 = arith.constant 0 : i32
    return %arg0, %c0_i32, %c0_i32_0 : i32, i32, i32
  }
}

module attributes {stable_mosaic.version = 11 : i64} {
  func.func @_bn_relu_kernel(%arg0: i32, %arg1: memref<16x128xf32, #tpu.memory_space<vmem>>, %arg2: memref<1x128xf32, #tpu.memory_space<vmem>>, %arg3: memref<1x128xf32, #tpu.memory_space<vmem>>, %arg4: memref<16x128xbf16, #tpu.memory_space<vmem>>) attributes {dimension_semantics = [#tpu.dimension_semantics<parallel>], iteration_bounds = array<i64: 4>, scalar_prefetch = 0 : i64, scratch_operands = 0 : i64, tpu.core_type = #tpu.core_type<tc>, window_params = [{transform_indices = @transform_0, window_bounds = array<i64: 16, 128>}, {pipeline_mode = #tpu.pipeline_mode<synchronous>, transform_indices = @transform_1, window_bounds = array<i64: 1, 128>}, {pipeline_mode = #tpu.pipeline_mode<synchronous>, transform_indices = @transform_2, window_bounds = array<i64: 1, 128>}, {transform_indices = @transform_3, window_bounds = array<i64: 16, 128>}]} {
    %c0 = arith.constant 0 : index
    %c0_0 = arith.constant 0 : index
    %0 = vector.load %arg1[%c0, %c0_0] : memref<16x128xf32, #tpu.memory_space<vmem>>, vector<16x128xf32>
    %c0_1 = arith.constant 0 : index
    %c0_2 = arith.constant 0 : index
    %1 = vector.load %arg2[%c0_1, %c0_2] : memref<1x128xf32, #tpu.memory_space<vmem>>, vector<1x128xf32>
    %2 = vector.broadcast %1 : vector<1x128xf32> to vector<16x128xf32>
    %3 = arith.mulf %0, %2 : vector<16x128xf32>
    %c0_3 = arith.constant 0 : index
    %c0_4 = arith.constant 0 : index
    %4 = vector.load %arg3[%c0_3, %c0_4] : memref<1x128xf32, #tpu.memory_space<vmem>>, vector<1x128xf32>
    %5 = vector.broadcast %4 : vector<1x128xf32> to vector<16x128xf32>
    %6 = arith.addf %3, %5 : vector<16x128xf32>
    %cst = arith.constant 0.000000e+00 : f32
    %7 = vector.broadcast %cst : f32 to vector<16x128xf32>
    %8 = arith.maximumf %6, %7 : vector<16x128xf32>
    %9 = arith.truncf %8 : vector<16x128xf32> to vector<16x128xbf16>
    %c0_5 = arith.constant 0 : index
    %c0_6 = arith.constant 0 : index
    %10 = vector.load %arg4[%c0_5, %c0_6] : memref<16x128xbf16, #tpu.memory_space<vmem>>, vector<16x128xbf16>
    tpu.vector_store %arg4[%c0_5, %c0_6], %9 {strides = array<i32>} : memref<16x128xbf16, #tpu.memory_space<vmem>>, vector<16x128xbf16>,
    return
  }
  func.func @transform_0(%arg0: i32) -> (i32, i32) {
    %c0_i32 = arith.constant 0 : i32
    %c0_i32_0 = arith.constant 0 : i32
    return %arg0, %c0_i32 : i32, i32
  }
  func.func @transform_1(%arg0: i32) -> (i32, i32) {
    %c0_i32 = arith.constant 0 : i32
    %c0_i32_0 = arith.constant 0 : i32
    %c0_i32_1 = arith.constant 0 : i32
    return %c0_i32, %c0_i32_0 : i32, i32
  }
  func.func @transform_2(%arg0: i32) -> (i32, i32) {
    %c0_i32 = arith.constant 0 : i32
    %c0_i32_0 = arith.constant 0 : i32
    %c0_i32_1 = arith.constant 0 : i32
    return %c0_i32, %c0_i32_0 : i32, i32
  }
  func.func @transform_3(%arg0: i32) -> (i32, i32) {
    %c0_i32 = arith.constant 0 : i32
    %c0_i32_0 = arith.constant 0 : i32
    return %arg0, %c0_i32 : i32, i32
  }
}

module attributes {stable_mosaic.version = 11 : i64} {
  func.func @_bn_relu_res_kernel(%arg0: i32, %arg1: memref<16x128xf32, #tpu.memory_space<vmem>>, %arg2: memref<1x128xf32, #tpu.memory_space<vmem>>, %arg3: memref<1x128xf32, #tpu.memory_space<vmem>>, %arg4: memref<16x128xf32, #tpu.memory_space<vmem>>, %arg5: memref<16x128xf32, #tpu.memory_space<vmem>>) attributes {dimension_semantics = [#tpu.dimension_semantics<parallel>], iteration_bounds = array<i64: 4>, scalar_prefetch = 0 : i64, scratch_operands = 0 : i64, tpu.core_type = #tpu.core_type<tc>, window_params = [{transform_indices = @transform_0, window_bounds = array<i64: 16, 128>}, {pipeline_mode = #tpu.pipeline_mode<synchronous>, transform_indices = @transform_1, window_bounds = array<i64: 1, 128>}, {pipeline_mode = #tpu.pipeline_mode<synchronous>, transform_indices = @transform_2, window_bounds = array<i64: 1, 128>}, {transform_indices = @transform_3, window_bounds = array<i64: 16, 128>}, {transform_indices = @transform_4, window_bounds = array<i64: 16, 128>}]} {
    %c0 = arith.constant 0 : index
    %c0_0 = arith.constant 0 : index
    %0 = vector.load %arg1[%c0, %c0_0] : memref<16x128xf32, #tpu.memory_space<vmem>>, vector<16x128xf32>
    %c0_1 = arith.constant 0 : index
    %c0_2 = arith.constant 0 : index
    %1 = vector.load %arg2[%c0_1, %c0_2] : memref<1x128xf32, #tpu.memory_space<vmem>>, vector<1x128xf32>
    %2 = vector.broadcast %1 : vector<1x128xf32> to vector<16x128xf32>
    %3 = arith.mulf %0, %2 : vector<16x128xf32>
    %c0_3 = arith.constant 0 : index
    %c0_4 = arith.constant 0 : index
    %4 = vector.load %arg3[%c0_3, %c0_4] : memref<1x128xf32, #tpu.memory_space<vmem>>, vector<1x128xf32>
    %5 = vector.broadcast %4 : vector<1x128xf32> to vector<16x128xf32>
    %6 = arith.addf %3, %5 : vector<16x128xf32>
    %c0_5 = arith.constant 0 : index
    %c0_6 = arith.constant 0 : index
    %7 = vector.load %arg4[%c0_5, %c0_6] : memref<16x128xf32, #tpu.memory_space<vmem>>, vector<16x128xf32>
    %8 = arith.addf %6, %7 : vector<16x128xf32>
    %cst = arith.constant 0.000000e+00 : f32
    %9 = vector.broadcast %cst : f32 to vector<16x128xf32>
    %10 = arith.maximumf %8, %9 : vector<16x128xf32>
    %c0_7 = arith.constant 0 : index
    %c0_8 = arith.constant 0 : index
    %11 = vector.load %arg5[%c0_7, %c0_8] : memref<16x128xf32, #tpu.memory_space<vmem>>, vector<16x128xf32>
    tpu.vector_store %arg5[%c0_7, %c0_8], %10 {strides = array<i32>} : memref<16x128xf32, #tpu.memory_space<vmem>>, vector<16x128xf32>,
    return
  }
  func.func @transform_0(%arg0: i32) -> (i32, i32) {
    %c0_i32 = arith.constant 0 : i32
    %c0_i32_0 = arith.constant 0 : i32
    return %arg0, %c0_i32 : i32, i32
  }
  func.func @transform_1(%arg0: i32) -> (i32, i32) {
    %c0_i32 = arith.constant 0 : i32
    %c0_i32_0 = arith.constant 0 : i32
    %c0_i32_1 = arith.constant 0 : i32
    return %c0_i32, %c0_i32_0 : i32, i32
  }
  func.func @transform_2(%arg0: i32) -> (i32, i32) {
    %c0_i32 = arith.constant 0 : i32
    %c0_i32_0 = arith.constant 0 : i32
    %c0_i32_1 = arith.constant 0 : i32
    return %c0_i32, %c0_i32_0 : i32, i32
  }
  func.func @transform_3(%arg0: i32) -> (i32, i32) {
    %c0_i32 = arith.constant 0 : i32
    %c0_i32_0 = arith.constant 0 : i32
    return %arg0, %c0_i32 : i32, i32
  }
  func.func @transform_4(%arg0: i32) -> (i32, i32) {
    %c0_i32 = arith.constant 0 : i32
    %c0_i32_0 = arith.constant 0 : i32
    return %arg0, %c0_i32 : i32, i32
  }
}

</mosaic_0001>

<bundles_post_ra>
// kernel: basic_block_forward.4
= control target key start
LH: loop header
LB: loop body
LE: loop exit
PB: predicated region body
PF: predicated region fallthrough
CT: control target
= control target key end

     0   :  { %s1254_s12 = smov 0   ;;  %s1579_s0 = inlined_call_operand.vmem [shape: bf16[1024,256], index: 0, kind: input, shape index: {}]   ;;  %s1580_s1 = inlined_call_operand.vmem [shape: bf16[256,8], index: 1, kind: input, shape index: {}]   ;;  %s1581_s2 = inlined_call_operand.vmem [shape: f32[1024,8], index: 2, kind: output, shape index: {0}]   ;;  %s1582_s3 = inlined_call_operand.vmem [shape: f32[4,2,8], index: 3, kind: output, shape index: {1}]  }
   0x1 LB: > { %s1260_s13 = sadd.s32 4294967295, %s1232_s12   ;;  %p968_p0 = scmp.ge.s32.totalorder %s1232_s12, 1  ;;  %s1232_s12 = sphi %s1254_s12, %s14_s12  }
   0x2   : > { %p142_p1 = scmp.lt.s32.totalorder %s1232_s12, 5 }
   0x4   : > { %p143_p2 = pnand %p968_p0, %p142_p1 }
   0x5   : > { %v1162_v0 = vld [vmem:[%s1580_s1 + $0x40] sm:$0xff] (!%p143_p2)   ;;  %s969_s16 = sshll.u32 (!%p143_p2), %s1260_s13, 5  ;;  %v1164_v2 = vld [vmem:[%s1580_s1 + $0x48] sm:$0xff] (!%p143_p2)   ;;  %v1166_v4 = vld [vmem:[%s1580_s1 + $0x50] sm:$0xff] (!%p143_p2)   ;;  %vm670_vm0 = vcmask (!%p143_p2), 64512   ;;  %p184_p4 = scmp.lt.s32.totalorder (!%p143_p2), %s1260_s13, 3 }
   0x6   : > { %146 = sbr.rel (%p143_p2) target bundleno = 362 (0x16a), region = 28  ;;  %v1163_v1 = vld [vmem:[%s1580_s1] sm:$0xff] (!%p143_p2)   ;;  %1026 = vmatprep.subr.bf16.mxu0 (!%p143_p2), %v1162_v0  ;;  %1138 = vmatprep.subr.bf16.mxu1 (!%p143_p2), %v1162_v0  ;;  %v1165_v3 = vld [vmem:[%s1580_s1 + $0x8] sm:$0xff] (!%p143_p2)   ;;  %p172_p3 = scmp.lt.s32.totalorder (!%p143_p2), %s969_s16, 127  ;;  %v1167_v5 = vld [vmem:[%s1580_s1 + $0x10] sm:$0xff] (!%p143_p2)   ;;  %vm873_vm1 = vcmask (!%p143_p2), 1040384  }
   0x7   : > { %1027 = vmatpush3.bf16.msra.mxu0 (!%p143_p2), %v1163_v1  ;;  %1146 = vmatpush3.bf16.msra.mxu1 (!%p143_p2), %v1163_v1  ;;  %v1168_v6 = vld [vmem:[%s1580_s1 + $0x58] sm:$0xff] (!%p143_p2)   ;;  %v1170_v8 = vld [vmem:[%s1580_s1 + $0x60] sm:$0xff] (!%p143_p2)   ;;  %v1172_v10 = vld [vmem:[%s1580_s1 + $0x68] sm:$0xff] (!%p143_p2)   ;;  %vm875_vm2 = vcmask (!%p143_p2), 58368  }
   0x8   : > { %1028 = vmatprep.subr.bf16.mxu0 (!%p143_p2), %v1164_v2  ;;  %1139 = vmatprep.subr.bf16.mxu1 (!%p143_p2), %v1164_v2  ;;  %v1169_v7 = vld [vmem:[%s1580_s1 + $0x18] sm:$0xff] (!%p143_p2)   ;;  %v1171_v9 = vld [vmem:[%s1580_s1 + $0x20] sm:$0xff] (!%p143_p2)   ;;  %v1173_v12 = vld [vmem:[%s1580_s1 + $0x28] sm:$0xff] (!%p143_p2)  }
   0x9   : > { %v1174_v13 = vld [vmem:[%s1580_s1 + $0x70] sm:$0xff] (!%p143_p2)   ;;  %v1176_v16 = vld [vmem:[%s1580_s1 + $0x78] sm:$0xff] (!%p143_p2)  }
   0xa   : > { %v1175_v15 = vld [vmem:[%s1580_s1 + $0x30] sm:$0xff] (!%p143_p2)   ;;  %v1177_v17 = vld [vmem:[%s1580_s1 + $0x38] sm:$0xff] (!%p143_p2)  }
   0xb   : > { %1029 = vmatpush3.bf16.msra.mxu0 (!%p143_p2), %v1165_v3  ;;  %1147 = vmatpush3.bf16.msra.mxu1 (!%p143_p2), %v1165_v3 }
   0xc   : > { %1030 = vmatprep.subr.bf16.mxu0 (!%p143_p2), %v1166_v4  ;;  %1140 = vmatprep.subr.bf16.mxu1 (!%p143_p2), %v1166_v4 }
   0xd   : > { %s1584_s16 = smov (!%p172_p3, %s969_s16), 127  ;;  %s1586_s13 = smov (!%p184_p4, %s1260_s13), 3 }
   0xe   : > { %s1025_s4 = sshll.u32 %s1584_s16, 3  ;;  %s974_s16 = sshll.u32 %s1586_s13, 1 }
   0xf   : > { %1031 = vmatpush3.bf16.msra.mxu0 %v1167_v5  ;;  %1148 = vmatpush3.bf16.msra.mxu1 %v1167_v5  ;;  %s1300_s9 = scalar_lea.vmem %s1579_s0, %s1025_s4  ;;  %s1360_s29 = scalar_lea.vmem %s1581_s2, %s1025_s4 }
  0x10   : > { %1032 = vmatprep.subr.bf16.mxu0 %v1168_v6  ;;  %1141 = vmatprep.subr.bf16.mxu1 %v1168_v6  ;;  %v1180_v11 = vld [vmem:[%s1300_s9 + $0x4] ss:$8 sps:$4 sm:$0xff]   ;;  %v1178_v18 = vld [vmem:[%s1300_s9] ss:$8 sps:$4 sm:$0xff]   ;;  %v1181_v19 = vld [vmem:[%s1300_s9 + $0x14] ss:$8 sps:$4 sm:$0xff]   ;;  %s187_s5 = scalar_lea.vmem %s1582_s3, %s974_s16 }
  0x11   : > { %541 = vmatprep.mubr.bf16.mxu0 %v1180_v11  ;;  %v1192_v14 = vld [vmem:[%s1300_s9 + $0x84] ss:$8 sps:$4 sm:$0xff]   ;;  %v1190_v20 = vld [vmem:[%s1300_s9 + $0x80] ss:$8 sps:$4 sm:$0xff]   ;;  %v1196_v21 = vld [vmem:[%s1300_s9 + $0x94] ss:$8 sps:$4 sm:$0xff]  }
  0x12   : > { %605 = vmatprep.mubr.bf16.mxu1 %v1192_v14  ;;  %v1183_v22 = vld [vmem:[%s1300_s9 + $0x10] ss:$8 sps:$4 sm:$0xff]   ;;  %v1184_v23 = vld [vmem:[%s1300_s9 + $0x24] ss:$8 sps:$4 sm:$0xff]   ;;  %v1186_v26 = vld [vmem:[%s1300_s9 + $0x20] ss:$8 sps:$4 sm:$0xff]  }
  0x13   : > { %1033 = vmatpush3.bf16.msra.mxu0 %v1169_v7  ;;  %1149 = vmatpush3.bf16.msra.mxu1 %v1169_v7  ;;  %v1198_v24 = vld [vmem:[%s1300_s9 + $0x90] ss:$8 sps:$4 sm:$0xff]   ;;  %v1202_v25 = vld [vmem:[%s1300_s9 + $0xa4] ss:$8 sps:$4 sm:$0xff]   ;;  %v1187_v27 = vld [vmem:[%s1300_s9 + $0x34] ss:$8 sps:$4 sm:$0xff]  }
  0x14   : > { %1034 = vmatprep.subr.bf16.mxu0 %v1170_v8  ;;  %1142 = vmatprep.subr.bf16.mxu1 %v1170_v8  ;;  %v1204_v28 = vld [vmem:[%s1300_s9 + $0xa0] ss:$8 sps:$4 sm:$0xff]   ;;  %v1208_v29 = vld [vmem:[%s1300_s9 + $0xb4] ss:$8 sps:$4 sm:$0xff]   ;;  %v1189_v30 = vld [vmem:[%s1300_s9 + $0x30] ss:$8 sps:$4 sm:$0xff]  }
  0x15   : > { %v1193_v31 = vld [vmem:[%s1300_s9 + $0x44] ss:$8 sps:$4 sm:$0xff]   ;;  %v1210_v32 = vld [vmem:[%s1300_s9 + $0xb0] ss:$8 sps:$4 sm:$0xff]   ;;  %v1195_v34 = vld [vmem:[%s1300_s9 + $0x40] ss:$8 sps:$4 sm:$0xff]  }
  0x16   : > { %v1214_v33 = vld [vmem:[%s1300_s9 + $0xc4] ss:$8 sps:$4 sm:$0xff]   ;;  %v1199_v35 = vld [vmem:[%s1300_s9 + $0x54] ss:$8 sps:$4 sm:$0xff]   ;;  %v1216_v36 = vld [vmem:[%s1300_s9 + $0xc0] ss:$8 sps:$4 sm:$0xff]  }
  0x17   : > { %1035 = vmatpush3.bf16.msra.mxu0 %v1171_v9  ;;  %1150 = vmatpush3.bf16.msra.mxu1 %v1171_v9  ;;  %v1217_v37 = vld [vmem:[%s1300_s9 + $0xd4] ss:$8 sps:$4 sm:$0xff]   ;;  %v1201_v38 = vld [vmem:[%s1300_s9 + $0x50] ss:$8 sps:$4 sm:$0xff]   ;;  %v1205_v39 = vld [vmem:[%s1300_s9 + $0x64] ss:$8 sps:$4 sm:$0xff]  }
  0x18   : > { %1036 = vmatprep.subr.bf16.mxu0 %v1172_v10  ;;  %1143 = vmatprep.subr.bf16.mxu1 %v1172_v10  ;;  %v1219_v40 = vld [vmem:[%s1300_s9 + $0xd0] ss:$8 sps:$4 sm:$0xff]   ;;  %v1220_v41 = vld [vmem:[%s1300_s9 + $0xe4] ss:$8 sps:$4 sm:$0xff]   ;;  %v1207_v42 = vld [vmem:[%s1300_s9 + $0x60] ss:$8 sps:$4 sm:$0xff]  }
  0x19   : > { %v1211_v43 = vld [vmem:[%s1300_s9 + $0x74] ss:$8 sps:$4 sm:$0xff]   ;;  %v1222_v44 = vld [vmem:[%s1300_s9 + $0xe0] ss:$8 sps:$4 sm:$0xff]   ;;  %v1213_v46 = vld [vmem:[%s1300_s9 + $0x70] ss:$8 sps:$4 sm:$0xff]  }
  0x1a   : > { %v1223_v45 = vld [vmem:[%s1300_s9 + $0xf4] ss:$8 sps:$4 sm:$0xff]   ;;  %v1225_v47 = vld [vmem:[%s1300_s9 + $0xf0] ss:$8 sps:$4 sm:$0xff]  }
  0x1b   : > { %1037 = vmatpush3.bf16.msra.mxu0 %v1173_v12  ;;  %1151 = vmatpush3.bf16.msra.mxu1 %v1173_v12 }
  0x1c   : > { %1038 = vmatprep.subr.bf16.mxu0 %v1174_v13  ;;  %1144 = vmatprep.subr.bf16.mxu1 %v1174_v13 }
  0x1f   : > { %1039 = vmatpush3.bf16.msra.mxu0 %v1175_v15  ;;  %1152 = vmatpush3.bf16.msra.mxu1 %v1175_v15 }
  0x20   : > { %1040 = vmatprep.subr.bf16.mxu0 %v1176_v16  ;;  %1145 = vmatprep.subr.bf16.mxu1 %v1176_v16 }
  0x23   : > { %1041 = vmatpush3.bf16.msra.mxu0 %v1177_v17  ;;  %1153 = vmatpush3.bf16.msra.mxu1 %v1177_v17 }
  0x26   : > { %542 = vmatmul.mubr.bf16.vlgmr.msra.gmra.mrb[0].mxu0 %v1178_v18  ;;  %606 = vmatmul.mubr.bf16.vlgmr.msra.gmra.mrb[0].mxu1 %v1190_v20 }
  0x27   : > { %549 = vmatprep.mubr.bf16.mxu0 %v1181_v19  ;;  %613 = vmatprep.mubr.bf16.mxu1 %v1196_v21 }
  0x2e   : > { %550 = vmatmul.mubr.bf16.gmra.mrb[4].mxu0 %v1183_v22  ;;  %614 = vmatmul.mubr.bf16.gmra.mrb[4].mxu1 %v1198_v24 }
  0x2f   : > { %557 = vmatprep.mubr.bf16.mxu0 %v1184_v23  ;;  %621 = vmatprep.mubr.bf16.mxu1 %v1202_v25 }
  0x36   : > { %558 = vmatmul.mubr.bf16.gmra.mrb[8].mxu0 %v1186_v26  ;;  %622 = vmatmul.mubr.bf16.gmra.mrb[8].mxu1 %v1204_v28 }
  0x37   : > { %565 = vmatprep.mubr.bf16.mxu0 %v1187_v27  ;;  %629 = vmatprep.mubr.bf16.mxu1 %v1208_v29 }
  0x3e   : > { %566 = vmatmul.mubr.bf16.gmra.mrb[12].mxu0 %v1189_v30  ;;  %630 = vmatmul.mubr.bf16.gmra.mrb[12].mxu1 %v1210_v32 }
  0x3f   : > { %573 = vmatprep.mubr.bf16.mxu0 %v1193_v31  ;;  %637 = vmatprep.mubr.bf16.mxu1 %v1214_v33 }
  0x46   : > { %574 = vmatmul.mubr.bf16.gmra.mrb[16].mxu0 %v1195_v34  ;;  %638 = vmatmul.mubr.bf16.gmra.mrb[16].mxu1 %v1216_v36 }
  0x47   : > { %581 = vmatprep.mubr.bf16.mxu0 %v1199_v35  ;;  %645 = vmatprep.mubr.bf16.mxu1 %v1217_v37 }
  0x4e   : > { %582 = vmatmul.mubr.bf16.gmra.mrb[20].mxu0 %v1201_v38  ;;  %646 = vmatmul.mubr.bf16.gmra.mrb[20].mxu1 %v1219_v40 }
  0x4f   : > { %589 = vmatprep.mubr.bf16.mxu0 %v1205_v39  ;;  %653 = vmatprep.mubr.bf16.mxu1 %v1220_v41 }
  0x56   : > { %590 = vmatmul.mubr.bf16.gmra.mrb[24].mxu0 %v1207_v42  ;;  %654 = vmatmul.mubr.bf16.gmra.mrb[24].mxu1 %v1222_v44 }
  0x57   : > { %597 = vmatprep.mubr.bf16.mxu0 %v1211_v43  ;;  %661 = vmatprep.mubr.bf16.mxu1 %v1223_v45 }
  0x5e   : > { %598 = vmatmul.mubr.bf16.gmra.mrb[28].mxu0 %v1213_v46  ;;  %662 = vmatmul.mubr.bf16.gmra.mrb[28].mxu1 %v1225_v47 }
  0xf9   : > { %v1042_v48 = vpop.f32.mrb[0].mxu0  ;;  %v1090_v50 = vpop.f32.mrb[0].mxu1 }
  0xfa   : > { %v1043_v49 = vpop.f32.mrb[1].mxu0  ;;  %v1091_v53 = vpop.f32.mrb[1].mxu1 }
  0xfb   : > { %v1044_v51 = vadd.f32 %v1043_v49, %v1042_v48  ;;  %v1045_v52 = vpop.f32.mrb[2].mxu0  ;;  %v1362_v55 = vadd.f32 %v1091_v53, %v1090_v50  ;;  %v1093_v56 = vpop.f32.mrb[2].mxu1 }
  0xfc   : > { %v1046_v54 = vpop.f32.mrb[3].mxu0  ;;  %v1094_v59 = vpop.f32.mrb[3].mxu1 }
  0xfd   : > { %671 = vst.msk [vmem:[%s1360_s29] sm:$0xff] %vm670_vm0, %v1044_v51  ;;  %v772_v57 = vmul.f32 %v1044_v51, %v1044_v51  ;;  %v1047_v58 = vadd.f32 %v1046_v54, %v1045_v52  ;;  %687 = vst.msk [vmem:[%s1360_s29 + $0x80] sm:$0xff] %vm670_vm0, %v1362_v55  ;;  %v1095_v60 = vadd.f32 %v1094_v59, %v1093_v56  ;;  %v703_v61 = vsel %vm670_vm0, %v1044_v51, 0.0 }
  0xff   : > { %672 = vst.msk [vmem:[%s1360_s29 + $0x8] sm:$0xff] %vm670_vm0, %v1047_v58  ;;  %v704_v62 = vsel %vm670_vm0, %v1047_v58, 0.0  ;;  %v773_v63 = vmul.f32 %v1047_v58, %v1047_v58  ;;  %688 = vst.msk [vmem:[%s1360_s29 + $0x88] sm:$0xff] %vm670_vm0, %v1095_v60  ;;  %v1376_v1 = vsel %vm670_vm0, %v1095_v60, 0.0  ;;  %v789_v2 = vmul.f32 %v1095_v60, %v1095_v60 }
 0x100   : > { %v705_v0 = vadd.f32 %v704_v62, %v703_v61  ;;  %v804_v3 = vsel %vm670_vm0, %v772_v57, 0.0 }
 0x101   : > { %v805_v4 = vsel %vm670_vm0, %v773_v63, 0.0  ;;  %v1048_v5 = vpop.f32.mrb[4].mxu0  ;;  %v1381_v8 = vsel %vm670_vm0, %v789_v2, 0.0  ;;  %v1096_v9 = vpop.f32.mrb[4].mxu1 }
 0x102   : > { %v806_v6 = vadd.f32 %v805_v4, %v804_v3  ;;  %v1049_v7 = vpop.f32.mrb[5].mxu0  ;;  %v1097_v12 = vpop.f32.mrb[5].mxu1 }
 0x103   : > { %v1050_v10 = vadd.f32 %v1049_v7, %v1048_v5  ;;  %v1051_v11 = vpop.f32.mrb[6].mxu0  ;;  %v1098_v14 = vadd.f32 %v1097_v12, %v1096_v9  ;;  %v1099_v15 = vpop.f32.mrb[6].mxu1 }
 0x104   : > { %v1052_v13 = vpop.f32.mrb[7].mxu0  ;;  %v1100_v19 = vpop.f32.mrb[7].mxu1 }
 0x105   : > { %673 = vst.msk [vmem:[%s1360_s29 + $0x10] sm:$0xff] %vm670_vm0, %v1050_v10  ;;  %v706_v16 = vsel %vm670_vm0, %v1050_v10, 0.0  ;;  %v774_v17 = vmul.f32 %v1050_v10, %v1050_v10  ;;  %v1053_v18 = vadd.f32 %v1052_v13, %v1051_v11  ;;  %689 = vst.msk [vmem:[%s1360_s29 + $0x90] sm:$0xff] %vm670_vm0, %v1098_v14  ;;  %v1389_v21 = vsel %vm670_vm0, %v1098_v14, 0.0 }
 0x106   : > { %v707_v20 = vadd.f32 %v706_v16, %v705_v0  ;;  %v790_v22 = vmul.f32 %v1098_v14, %v1098_v14  ;;  %v1101_v23 = vadd.f32 %v1100_v19, %v1099_v15 }
 0x107   : > { %v807_v24 = vsel %vm670_vm0, %v774_v17, 0.0  ;;  %674 = vst.msk [vmem:[%s1360_s29 + $0x18] sm:$0xff] %vm670_vm0, %v1053_v18  ;;  %v708_v25 = vsel %vm670_vm0, %v1053_v18, 0.0  ;;  %v775_v26 = vmul.f32 %v1053_v18, %v1053_v18 }
 0x108   : > { %v808_v27 = vadd.f32 %v807_v24, %v806_v6  ;;  %v709_v28 = vadd.f32 %v708_v25, %v707_v20  ;;  %v1396_v29 = vsel %vm670_vm0, %v790_v22, 0.0  ;;  %690 = vst.msk [vmem:[%s1360_s29 + $0x98] sm:$0xff] %vm670_vm0, %v1101_v23  ;;  %v1401_v30 = vsel %vm670_vm0, %v1101_v23, 0.0 }
 0x109   : > { %v809_v31 = vsel %vm670_vm0, %v775_v26, 0.0  ;;  %v1054_v32 = vpop.f32.mrb[8].mxu0  ;;  %v791_v33 = vmul.f32 %v1101_v23, %v1101_v23  ;;  %v1102_v36 = vpop.f32.mrb[8].mxu1 }
 0x10a   : > { %v810_v34 = vadd.f32 %v809_v31, %v808_v27  ;;  %v1055_v35 = vpop.f32.mrb[9].mxu0  ;;  %v1103_v40 = vpop.f32.mrb[9].mxu1 }
 0x10b   : > { %v1056_v37 = vadd.f32 %v1055_v35, %v1054_v32  ;;  %v1057_v38 = vpop.f32.mrb[10].mxu0  ;;  %v1405_v39 = vsel %vm670_vm0, %v791_v33, 0.0  ;;  %v1104_v42 = vadd.f32 %v1103_v40, %v1102_v36  ;;  %v1105_v43 = vpop.f32.mrb[10].mxu1 }
 0x10c   : > { %v1058_v41 = vpop.f32.mrb[11].mxu0  ;;  %v1106_v47 = vpop.f32.mrb[11].mxu1 }
 0x10d   : > { %675 = vst.msk [vmem:[%s1360_s29 + $0x20] sm:$0xff] %vm670_vm0, %v1056_v37  ;;  %v710_v44 = vsel %vm670_vm0, %v1056_v37, 0.0  ;;  %v776_v45 = vmul.f32 %v1056_v37, %v1056_v37  ;;  %v1059_v46 = vadd.f32 %v1058_v41, %v1057_v38  ;;  %691 = vst.msk [vmem:[%s1360_s29 + $0xa0] sm:$0xff] %vm670_vm0, %v1104_v42  ;;  %v1413_v49 = vsel %vm670_vm0, %v1104_v42, 0.0 }
 0x10e   : > { %v711_v48 = vadd.f32 %v710_v44, %v709_v28  ;;  %v792_v50 = vmul.f32 %v1104_v42, %v1104_v42  ;;  %v1107_v51 = vadd.f32 %v1106_v47, %v1105_v43 }
 0x10f   : > { %v811_v52 = vsel %vm670_vm0, %v776_v45, 0.0  ;;  %676 = vst.msk [vmem:[%s1360_s29 + $0x28] sm:$0xff] %vm670_vm0, %v1059_v46  ;;  %v712_v53 = vsel %vm670_vm0, %v1059_v46, 0.0  ;;  %v777_v54 = vmul.f32 %v1059_v46, %v1059_v46 }
 0x110   : > { %v812_v56 = vadd.f32 %v811_v52, %v810_v34  ;;  %v713_v57 = vadd.f32 %v712_v53, %v711_v48  ;;  %v1420_v58 = vsel %vm670_vm0, %v792_v50, 0.0  ;;  %692 = vst.msk [vmem:[%s1360_s29 + $0xa8] sm:$0xff] %vm670_vm0, %v1107_v51  ;;  %v1425_v59 = vsel %vm670_vm0, %v1107_v51, 0.0 }
 0x111   : > { %v813_v60 = vsel %vm670_vm0, %v777_v54, 0.0  ;;  %v1060_v61 = vpop.f32.mrb[12].mxu0  ;;  %v793_v62 = vmul.f32 %v1107_v51, %v1107_v51  ;;  %v1108_v2 = vpop.f32.mrb[12].mxu1 }
 0x112   : > { %v814_v63 = vadd.f32 %v813_v60, %v812_v56  ;;  %v1061_v0 = vpop.f32.mrb[13].mxu0  ;;  %v1109_v6 = vpop.f32.mrb[13].mxu1 }
 0x113   : > { %v1062_v3 = vadd.f32 %v1061_v0, %v1060_v61  ;;  %v1063_v4 = vpop.f32.mrb[14].mxu0  ;;  %v1429_v5 = vsel %vm670_vm0, %v793_v62, 0.0  ;;  %v1110_v9 = vadd.f32 %v1109_v6, %v1108_v2  ;;  %v1111_v10 = vpop.f32.mrb[14].mxu1 }
 0x114   : > { %v1064_v7 = vpop.f32.mrb[15].mxu0  ;;  %v1112_v14 = vpop.f32.mrb[15].mxu1 }
 0x115   : > { %677 = vst.msk [vmem:[%s1360_s29 + $0x30] sm:$0xff] %vm670_vm0, %v1062_v3  ;;  %v714_v11 = vsel %vm670_vm0, %v1062_v3, 0.0  ;;  %v778_v12 = vmul.f32 %v1062_v3, %v1062_v3  ;;  %v1065_v13 = vadd.f32 %v1064_v7, %v1063_v4  ;;  %693 = vst.msk [vmem:[%s1360_s29 + $0xb0] sm:$0xff] %vm670_vm0, %v1110_v9  ;;  %v1437_v16 = vsel %vm670_vm0, %v1110_v9, 0.0 }
 0x116   : > { %v715_v15 = vadd.f32 %v714_v11, %v713_v57  ;;  %v794_v17 = vmul.f32 %v1110_v9, %v1110_v9  ;;  %v1113_v18 = vadd.f32 %v1112_v14, %v1111_v10 }
 0x117   : > { %v815_v19 = vsel %vm670_vm0, %v778_v12, 0.0  ;;  %678 = vst.msk [vmem:[%s1360_s29 + $0x38] sm:$0xff] %vm670_vm0, %v1065_v13  ;;  %v716_v20 = vsel %vm670_vm0, %v1065_v13, 0.0  ;;  %v779_v22 = vmul.f32 %v1065_v13, %v1065_v13 }
 0x118   : > { %v816_v23 = vadd.f32 %v815_v19, %v814_v63  ;;  %v717_v24 = vadd.f32 %v716_v20, %v715_v15  ;;  %v1444_v25 = vsel %vm670_vm0, %v794_v17, 0.0  ;;  %694 = vst.msk [vmem:[%s1360_s29 + $0xb8] sm:$0xff] %vm670_vm0, %v1113_v18  ;;  %v1449_v26 = vsel %vm670_vm0, %v1113_v18, 0.0 }
 0x119   : > { %v817_v27 = vsel %vm670_vm0, %v779_v22, 0.0  ;;  %v1066_v28 = vpop.f32.mrb[16].mxu0  ;;  %v795_v31 = vmul.f32 %v1113_v18, %v1113_v18  ;;  %v1114_v34 = vpop.f32.mrb[16].mxu1 }
 0x11a   : > { %v818_v32 = vadd.f32 %v817_v27, %v816_v23  ;;  %v1067_v33 = vpop.f32.mrb[17].mxu0  ;;  %v1115_v38 = vpop.f32.mrb[17].mxu1 }
 0x11b   : > { %v1068_v35 = vadd.f32 %v1067_v33, %v1066_v28  ;;  %v1069_v36 = vpop.f32.mrb[18].mxu0  ;;  %v1453_v37 = vsel %vm670_vm0, %v795_v31, 0.0  ;;  %v1116_v41 = vadd.f32 %v1115_v38, %v1114_v34  ;;  %v1117_v42 = vpop.f32.mrb[18].mxu1 }
 0x11c   : > { %v1070_v40 = vpop.f32.mrb[19].mxu0  ;;  %v1118_v46 = vpop.f32.mrb[19].mxu1 }
 0x11d   : > { %679 = vst.msk [vmem:[%s1360_s29 + $0x40] sm:$0xff] %vm670_vm0, %v1068_v35  ;;  %v718_v43 = vsel %vm670_vm0, %v1068_v35, 0.0  ;;  %v780_v44 = vmul.f32 %v1068_v35, %v1068_v35  ;;  %v1071_v45 = vadd.f32 %v1070_v40, %v1069_v36  ;;  %695 = vst.msk [vmem:[%s1360_s29 + $0xc0] sm:$0xff] %vm670_vm0, %v1116_v41  ;;  %v1461_v48 = vsel %vm670_vm0, %v1116_v41, 0.0 }
 0x11e   : > { %v719_v47 = vadd.f32 %v718_v43, %v717_v24  ;;  %v796_v50 = vmul.f32 %v1116_v41, %v1116_v41  ;;  %v1119_v51 = vadd.f32 %v1118_v46, %v1117_v42 }
 0x11f   : > { %v819_v52 = vsel %vm670_vm0, %v780_v44, 0.0  ;;  %680 = vst.msk [vmem:[%s1360_s29 + $0x48] sm:$0xff] %vm670_vm0, %v1071_v45  ;;  %v720_v53 = vsel %vm670_vm0, %v1071_v45, 0.0  ;;  %v781_v54 = vmul.f32 %v1071_v45, %v1071_v45 }
 0x120   : > { %v820_v56 = vadd.f32 %v819_v52, %v818_v32  ;;  %v721_v57 = vadd.f32 %v720_v53, %v719_v47  ;;  %v1468_v60 = vsel %vm670_vm0, %v796_v50, 0.0  ;;  %696 = vst.msk [vmem:[%s1360_s29 + $0xc8] sm:$0xff] %vm670_vm0, %v1119_v51  ;;  %v1473_v61 = vsel %vm670_vm0, %v1119_v51, 0.0 }
 0x121   : > { %v821_v62 = vsel %vm670_vm0, %v781_v54, 0.0  ;;  %v1072_v63 = vpop.f32.mrb[20].mxu0  ;;  %v797_v0 = vmul.f32 %v1119_v51, %v1119_v51  ;;  %v1120_v4 = vpop.f32.mrb[20].mxu1 }
 0x122   : > { %v822_v2 = vadd.f32 %v821_v62, %v820_v56  ;;  %v1073_v3 = vpop.f32.mrb[21].mxu0  ;;  %v1121_v10 = vpop.f32.mrb[21].mxu1 }
 0x123   : > { %v1074_v6 = vadd.f32 %v1073_v3, %v1072_v63  ;;  %v1075_v7 = vpop.f32.mrb[22].mxu0  ;;  %v1477_v9 = vsel %vm670_vm0, %v797_v0, 0.0  ;;  %v1122_v12 = vadd.f32 %v1121_v10, %v1120_v4  ;;  %v1123_v13 = vpop.f32.mrb[22].mxu1 }
 0x124   : > { %v1076_v11 = vpop.f32.mrb[23].mxu0  ;;  %v1124_v18 = vpop.f32.mrb[23].mxu1 }
 0x125   : > { %681 = vst.msk [vmem:[%s1360_s29 + $0x50] sm:$0xff] %vm670_vm0, %v1074_v6  ;;  %v722_v14 = vsel %vm670_vm0, %v1074_v6, 0.0  ;;  %v782_v15 = vmul.f32 %v1074_v6, %v1074_v6  ;;  %v1077_v17 = vadd.f32 %v1076_v11, %v1075_v7  ;;  %697 = vst.msk [vmem:[%s1360_s29 + $0xd0] sm:$0xff] %vm670_vm0, %v1122_v12  ;;  %v1485_v20 = vsel %vm670_vm0, %v1122_v12, 0.0 }
 0x126   : > { %v723_v19 = vadd.f32 %v722_v14, %v721_v57  ;;  %v798_v22 = vmul.f32 %v1122_v12, %v1122_v12  ;;  %v1125_v23 = vadd.f32 %v1124_v18, %v1123_v13 }
 0x127   : > { %v823_v24 = vsel %vm670_vm0, %v782_v15, 0.0  ;;  %682 = vst.msk [vmem:[%s1360_s29 + $0x58] sm:$0xff] %vm670_vm0, %v1077_v17  ;;  %v724_v27 = vsel %vm670_vm0, %v1077_v17, 0.0  ;;  %v783_v28 = vmul.f32 %v1077_v17, %v1077_v17 }
 0x128   : > { %v824_v31 = vadd.f32 %v823_v24, %v822_v2  ;;  %v725_v32 = vadd.f32 %v724_v27, %v723_v19  ;;  %v1492_v33 = vsel %vm670_vm0, %v798_v22, 0.0  ;;  %698 = vst.msk [vmem:[%s1360_s29 + $0xd8] sm:$0xff] %vm670_vm0, %v1125_v23  ;;  %v1497_v34 = vsel %vm670_vm0, %v1125_v23, 0.0 }
 0x129   : > { %v825_v35 = vsel %vm670_vm0, %v783_v28, 0.0  ;;  %v1078_v36 = vpop.f32.mrb[24].mxu0  ;;  %v799_v38 = vmul.f32 %v1125_v23, %v1125_v23  ;;  %v1126_v42 = vpop.f32.mrb[24].mxu1 }
 0x12a   : > { %v826_v40 = vadd.f32 %v825_v35, %v824_v31  ;;  %v1079_v41 = vpop.f32.mrb[25].mxu0  ;;  %v1127_v46 = vpop.f32.mrb[25].mxu1 }
 0x12b   : > { %v1080_v43 = vadd.f32 %v1079_v41, %v1078_v36  ;;  %v1081_v44 = vpop.f32.mrb[26].mxu0  ;;  %v1501_v45 = vsel %vm670_vm0, %v799_v38, 0.0  ;;  %v1128_v50 = vadd.f32 %v1127_v46, %v1126_v42  ;;  %v1129_v51 = vpop.f32.mrb[26].mxu1 }
 0x12c   : > { %v1082_v47 = vpop.f32.mrb[27].mxu0  ;;  %v1130_v56 = vpop.f32.mrb[27].mxu1 }
 0x12d   : > { %683 = vst.msk [vmem:[%s1360_s29 + $0x60] sm:$0xff] %vm670_vm0, %v1080_v43  ;;  %v726_v52 = vsel %vm670_vm0, %v1080_v43, 0.0  ;;  %v784_v53 = vmul.f32 %v1080_v43, %v1080_v43  ;;  %v1083_v54 = vadd.f32 %v1082_v47, %v1081_v44  ;;  %699 = vst.msk [vmem:[%s1360_s29 + $0xe0] sm:$0xff] %vm670_vm0, %v1128_v50  ;;  %v1509_v62 = vsel %vm670_vm0, %v1128_v50, 0.0 }
 0x12e   : > { %v727_v57 = vadd.f32 %v726_v52, %v725_v32  ;;  %v800_v63 = vmul.f32 %v1128_v50, %v1128_v50  ;;  %v1131_v0 = vadd.f32 %v1130_v56, %v1129_v51  ;;  %v788_v44 = vmul.f32 %v1362_v55, %v1362_v55 }
 0x12f   : > { %v827_v2 = vsel %vm670_vm0, %v784_v53, 0.0  ;;  %684 = vst.msk [vmem:[%s1360_s29 + $0x68] sm:$0xff] %vm670_vm0, %v1083_v54  ;;  %v728_v3 = vsel %vm670_vm0, %v1083_v54, 0.0  ;;  %v785_v4 = vmul.f32 %v1083_v54, %v1083_v54  ;;  %v734_v56 = vsel %vm670_vm0, %v1362_v55, 0.0 }
 0x130   : > { %v828_v6 = vadd.f32 %v827_v2, %v826_v40  ;;  %v729_v7 = vadd.f32 %v728_v3, %v727_v57  ;;  %v1516_v10 = vsel %vm670_vm0, %v800_v63, 0.0  ;;  %700 = vst.msk [vmem:[%s1360_s29 + $0xe8] sm:$0xff] %vm670_vm0, %v1131_v0  ;;  %v1521_v11 = vsel %vm670_vm0, %v1131_v0, 0.0 }
 0x131   : > { %v829_v12 = vsel %vm670_vm0, %v785_v4, 0.0  ;;  %v1084_v13 = vpop.f32.mrb[28].mxu0  ;;  %v801_v14 = vmul.f32 %v1131_v0, %v1131_v0  ;;  %v1132_v18 = vpop.f32.mrb[28].mxu1  ;;  %v835_v3 = vsel %vm670_vm0, %v788_v44, 0.0 }
 0x132   : > { %v830_v15 = vadd.f32 %v829_v12, %v828_v6  ;;  %v1085_v17 = vpop.f32.mrb[29].mxu0  ;;  %v1133_v24 = vpop.f32.mrb[29].mxu1 }
 0x133   : > { %v1086_v19 = vadd.f32 %v1085_v17, %v1084_v13  ;;  %v1087_v22 = vpop.f32.mrb[30].mxu0  ;;  %v861_v23 = vsel %vm670_vm0, %v801_v14, 0.0  ;;  %v1134_v28 = vadd.f32 %v1133_v24, %v1132_v18  ;;  %v1135_v31 = vpop.f32.mrb[30].mxu1 }
 0x134   : > { %v1088_v27 = vpop.f32.mrb[31].mxu0  ;;  %v1136_v38 = vpop.f32.mrb[31].mxu1 }
 0x135   : > { %685 = vst.msk [vmem:[%s1360_s29 + $0x70] sm:$0xff] %vm670_vm0, %v1086_v19  ;;  %v730_v32 = vsel %vm670_vm0, %v1086_v19, 0.0  ;;  %v786_v35 = vmul.f32 %v1086_v19, %v1086_v19  ;;  %v1089_v36 = vadd.f32 %v1088_v27, %v1087_v22  ;;  %701 = vst.msk [vmem:[%s1360_s29 + $0xf0] sm:$0xff] %vm670_vm0, %v1134_v28  ;;  %v762_v41 = vsel %vm670_vm0, %v1134_v28, 0.0 }
 0x136   : > { %v731_v40 = vadd.f32 %v730_v32, %v729_v7  ;;  %v802_v42 = vmul.f32 %v1134_v28, %v1134_v28  ;;  %v1137_v43 = vadd.f32 %v1136_v38, %v1135_v31 }
 0x137   : > { %v831_v46 = vsel %vm670_vm0, %v786_v35, 0.0  ;;  %686 = vst.msk [vmem:[%s1360_s29 + $0x78] sm:$0xff] %vm670_vm0, %v1089_v36  ;;  %v732_v47 = vsel %vm670_vm0, %v1089_v36, 0.0  ;;  %v787_v50 = vmul.f32 %v1089_v36, %v1089_v36 }
 0x138   : > { %v832_v51 = vadd.f32 %v831_v46, %v830_v15  ;;  %v733_v52 = vadd.f32 %v732_v47, %v731_v40  ;;  %v863_v53 = vsel %vm670_vm0, %v802_v42, 0.0  ;;  %702 = vst.msk [vmem:[%s1360_s29 + $0xf8] sm:$0xff] %vm670_vm0, %v1137_v43  ;;  %v764_v54 = vsel %vm670_vm0, %v1137_v43, 0.0 }
 0x139   : > { %v833_v57 = vsel %vm670_vm0, %v787_v50, 0.0  ;;  %v803_v63 = vmul.f32 %v1137_v43, %v1137_v43 }
 0x13a   : > { %v735_v0 = vadd.f32 %v734_v56, %v733_v52  ;;  %v834_v2 = vadd.f32 %v833_v57, %v832_v51 }
 0x13b   : > { %v865_v4 = vsel %vm670_vm0, %v803_v63, 0.0 }
 0x13c   : > { %v737_v6 = vadd.f32 %v1376_v1, %v735_v0  ;;  %v836_v7 = vadd.f32 %v835_v3, %v834_v2 }
 0x13e   : > { %v739_v12 = vadd.f32 %v1389_v21, %v737_v6  ;;  %v838_v13 = vadd.f32 %v1381_v8, %v836_v7 }
 0x140   : > { %v741_v14 = vadd.f32 %v1401_v30, %v739_v12  ;;  %v840_v55 = vadd.f32 %v1396_v29, %v838_v13 }
 0x142   : > { %v842_v15 = vadd.f32 %v1405_v39, %v840_v55  ;;  %v743_v17 = vadd.f32 %v1413_v49, %v741_v14 }
 0x144   : > { %v745_v18 = vadd.f32 %v1425_v59, %v743_v17  ;;  %v844_v19 = vadd.f32 %v1420_v58, %v842_v15 }
 0x146   : > { %v747_v22 = vadd.f32 %v1437_v16, %v745_v18  ;;  %v846_v1 = vadd.f32 %v1429_v5, %v844_v19 }
 0x148   : > { %v749_v21 = vadd.f32 %v1449_v26, %v747_v22  ;;  %v848_v8 = vadd.f32 %v1444_v25, %v846_v1 }
 0x14a   : > { %v751_v30 = vadd.f32 %v1461_v48, %v749_v21  ;;  %v850_v29 = vadd.f32 %v1453_v37, %v848_v8 }
 0x14c   : > { %v852_v39 = vadd.f32 %v1468_v60, %v850_v29  ;;  %v753_v49 = vadd.f32 %v1473_v61, %v751_v30 }
 0x14e   : > { %v854_v59 = vadd.f32 %v1477_v9, %v852_v39  ;;  %v755_v58 = vadd.f32 %v1485_v20, %v753_v49 }
 0x150   : > { %v856_v16 = vadd.f32 %v1492_v33, %v854_v59  ;;  %v757_v5 = vadd.f32 %v1497_v34, %v755_v58 }
 0x152   : > { %v858_v25 = vadd.f32 %v1501_v45, %v856_v16  ;;  %v759_v26 = vadd.f32 %v1509_v62, %v757_v5 }
 0x154   : > { %v860_v37 = vadd.f32 %v1516_v10, %v858_v25  ;;  %v761_v48 = vadd.f32 %v1521_v11, %v759_v26 }
 0x156   : > { %v862_v60 = vadd.f32 %v861_v23, %v860_v37  ;;  %v763_v24 = vadd.f32 %v762_v41, %v761_v48 }
 0x158   : > { %v864_v61 = vadd.f32 %v863_v53, %v862_v60  ;;  %v765_v27 = vadd.f32 %v764_v54, %v763_v24 }
 0x15a   : > { %v766_v9 = vrot.slane %v765_v27, 4  ;;  %v866_v28 = vadd.f32 %v865_v4, %v864_v61 }
 0x15c   : > { %v767_v20 = vadd.f32 %v766_v9, %v765_v27  ;;  %v867_v33 = vrot.slane %v866_v28, 4 }
 0x15e   : > { %v768_v31 = vrot.slane %v767_v20, 2  ;;  %v868_v34 = vadd.f32 %v867_v33, %v866_v28 }
 0x160   : > { %v769_v32 = vadd.f32 %v768_v31, %v767_v20  ;;  %v869_v45 = vrot.slane %v868_v34, 2 }
 0x162   : > { %v770_v35 = vrot.slane %v769_v32, 1  ;;  %v870_v62 = vadd.f32 %v869_v45, %v868_v34 }
 0x164   : > { %v871_v10 = vrot.slane %v870_v62, 1  ;;  %v771_v11 = vadd.f32 %v770_v35, %v769_v32 }
 0x166   : > { %v872_v23 = vadd.f32 %v871_v10, %v870_v62 }
 0x168   : > { %v874_v36 = vsel %vm873_vm1, %v771_v11, %v872_v23 }
 0x169   : > { %876 = vst.msk [vmem:[%s187_s5] sm:$0x3] %vm875_vm2, %v874_v36 }
 0x16a PF: > { %s14_s12 = sadd.s32 1, %s1232_s12  }
 0x16b   : > { %p11_p5 = scmp.ge.s32.totalorder %s14_s12, 6  }
 0x16d   :  { %13 = sbr.rel (!%p11_p5) target bundleno = 1 (0x1), region = 70 }

// kernel: tile.23
= control target key start
LH: loop header
LB: loop body
LE: loop exit
PB: predicated region body
PF: predicated region fallthrough
CT: control target
= control target key end

     0   :  { %s28_s0 = inlined_call_operand.vmem [shape: f32[8], index: 0, kind: input, shape index: {}]   ;;  %s29_s1 = inlined_call_operand.vmem [shape: f32[16,8], index: 1, kind: output, shape index: {}]  }
   0x1   :  { %v4_v0 = vld [vmem:[%s28_s0] ss:$0 sm:$0xff] }
   0x2   :  { %5 = vst [vmem:[%s29_s1] sm:$0xff] %v4_v0  ;;  %8 = vst [vmem:[%s29_s1 + $0x8] sm:$0xff] %v4_v0 }

// kernel: tile.24
= control target key start
LH: loop header
LB: loop body
LE: loop exit
PB: predicated region body
PF: predicated region fallthrough
CT: control target
= control target key end

     0   :  { %s131_s10 = smov 120   ;;  %s132_s11 = smov 104   ;;  %vm3_vm0 = vcmask 64512   ;;  %vm9_vm1 = vcmask 1048512   ;;  %vm15_vm2 = vcmask 982912   ;;  %vm21_vm3 = vcmask 917312   ;;  %s207_s0 = inlined_call_operand.vmem [shape: f32[16,8], index: 0, kind: input, shape index: {}]   ;;  %s208_s1 = inlined_call_operand.vmem [shape: f32[1,128], index: 1, kind: output, shape index: {}]  }
   0x1   :  { %v101_v0 = vld [vmem:[%s207_s0 + $0xf] sm:$0x1]   ;;  %v103_v1 = vld [vmem:[%s207_s0 + $0xd] sm:$0x1]   ;;  %v102_v2 = vld [vmem:[%s207_s0 + $0xe] sm:$0x1]  }
   0x2   :  { %7 = vrot.lane.b32.xlu0 %v101_v0, %s131_s10  ;;  %19 = vrot.lane.b32.xlu1 %v103_v1, %s132_s11  ;;  %v104_v3 = vld [vmem:[%s207_s0 + $0xc] sm:$0x1]   ;;  %s133_s16 = smov 112   ;;  %s134_s17 = smov 96   ;;  %v105_v4 = vld [vmem:[%s207_s0 + $0xb] sm:$0x1]  }
   0x3   :  { %v106_v5 = vld [vmem:[%s207_s0 + $0xa] sm:$0x1]   ;;  %v2_v6 = vld [vmem:[%s207_s0] sm:$0x1]   ;;  %s135_s24 = smov 88   ;;  %s136_s25 = smov 80  }
   0x4   :  { %4 = vst.msk [vmem:[#allocation0] sm:$0x1] %vm3_vm0, %v2_v6   ;;  %v107_v7 = vld [vmem:[%s207_s0 + $0x9] sm:$0x1]   ;;  %v108_v8 = vld [vmem:[%s207_s0 + $0x8] sm:$0x1]  }
   0x5   :  { %s137_s30 = smov 72   ;;  %s138_s2 = smov 64   ;;  %v109_v9 = vld [vmem:[%s207_s0 + $0x7] sm:$0x1]   ;;  %v110_v10 = vld [vmem:[%s207_s0 + $0x6] sm:$0x1]  }
   0x6   :  { %13 = vrot.lane.b32.xlu0 %v102_v2, %s133_s16  ;;  %25 = vrot.lane.b32.xlu1 %v104_v3, %s134_s17  ;;  %s139_s7 = smov 56   ;;  %s140_s8 = smov 48   ;;  %v111_v11 = vld [vmem:[%s207_s0 + $0x5] sm:$0x1]   ;;  %v112_v12 = vld [vmem:[%s207_s0 + $0x4] sm:$0x1]  }
   0x7   :  { %s141_s13 = smov 40   ;;  %s142_s14 = smov 32   ;;  %v113_v13 = vld [vmem:[%s207_s0 + $0x3] sm:$0x1]   ;;  %v114_v14 = vld [vmem:[%s207_s0 + $0x2] sm:$0x1]  }
   0x8   :  { %s143_s19 = smov 24   ;;  %s144_s20 = smov 16   ;;  %v115_v15 = vld [vmem:[%s207_s0 + $0x1] sm:$0x1]   ;;  %vm27_vm4 = vcmask 851712   ;;  %vm33_vm5 = vcmask 786112  }
   0x9   :  { %s145_s0 = smov 8   ;;  %vm39_vm6 = vcmask 720512   ;;  %vm45_vm7 = vcmask 654912   ;;  %vm51_vm8 = vcmask 589312   ;;  %vm57_vm9 = vcmask 523712  }
   0xa   :  { %31 = vrot.lane.b32.xlu0 %v105_v4, %s135_s24  ;;  %37 = vrot.lane.b32.xlu1 %v106_v5, %s136_s25  ;;  %vm63_vm10 = vcmask 458112   ;;  %vm69_vm11 = vcmask 392512   ;;  %vm75_vm12 = vcmask 326912   ;;  %vm81_vm13 = vcmask 261312  }
   0xb   :  { %vm87_vm14 = vcmask 195712   ;;  %vm93_vm15 = vcmask 130112  }
   0xe   :  { %43 = vrot.lane.b32.xlu0 %v107_v7, %s137_s30  ;;  %49 = vrot.lane.b32.xlu1 %v108_v8, %s138_s2 }
  0x12   :  { %55 = vrot.lane.b32.xlu0 %v109_v9, %s139_s7  ;;  %61 = vrot.lane.b32.xlu1 %v110_v10, %s140_s8 }
  0x16   :  { %67 = vrot.lane.b32.xlu0 %v111_v11, %s141_s13  ;;  %73 = vrot.lane.b32.xlu1 %v112_v12, %s142_s14 }
  0x1a   :  { %79 = vrot.lane.b32.xlu0 %v113_v13, %s143_s19  ;;  %85 = vrot.lane.b32.xlu1 %v114_v14, %s144_s20 }
  0x1e   :  { %91 = vrot.lane.b32.xlu0 %v115_v15, %s145_s0 }
  0x74   :  { %v8_v16 = vpop.permute.xlu0 %7   ;;  %v20_v17 = vpop.permute.xlu1 %19  }
  0x75   :  { %10 = vst.msk [vmem:[#allocation0] sm:$0x1] %vm9_vm1, %v8_v16  }
  0x78   :  { %v14_v18 = vpop.permute.xlu0 %13   ;;  %v26_v19 = vpop.permute.xlu1 %25  }
  0x79   :  { %16 = vst.msk [vmem:[#allocation0] sm:$0x1] %vm15_vm2, %v14_v18  }
  0x7a   :  { %22 = vst.msk [vmem:[#allocation0] sm:$0x1] %vm21_vm3, %v20_v17  }
  0x7b   :  { %28 = vst.msk [vmem:[#allocation0] sm:$0x1] %vm27_vm4, %v26_v19  }
  0x7c   :  { %v32_v20 = vpop.permute.xlu0 %31   ;;  %v38_v21 = vpop.permute.xlu1 %37  }
  0x7d   :  { %34 = vst.msk [vmem:[#allocation0] sm:$0x1] %vm33_vm5, %v32_v20  }
  0x7e   :  { %40 = vst.msk [vmem:[#allocation0] sm:$0x1] %vm39_vm6, %v38_v21  }
  0x80   :  { %v44_v22 = vpop.permute.xlu0 %43   ;;  %v50_v23 = vpop.permute.xlu1 %49  }
  0x81   :  { %46 = vst.msk [vmem:[#allocation0] sm:$0x1] %vm45_vm7, %v44_v22  }
  0x82   :  { %52 = vst.msk [vmem:[#allocation0] sm:$0x1] %vm51_vm8, %v50_v23  }
  0x84   :  { %v56_v24 = vpop.permute.xlu0 %55   ;;  %v62_v25 = vpop.permute.xlu1 %61  }
  0x85   :  { %58 = vst.msk [vmem:[#allocation0] sm:$0x1] %vm57_vm9, %v56_v24  }
  0x86   :  { %64 = vst.msk [vmem:[#allocation0] sm:$0x1] %vm63_vm10, %v62_v25  }
  0x88   :  { %v68_v26 = vpop.permute.xlu0 %67   ;;  %v74_v27 = vpop.permute.xlu1 %73  }
  0x89   :  { %70 = vst.msk [vmem:[#allocation0] sm:$0x1] %vm69_vm11, %v68_v26  }
  0x8a   :  { %76 = vst.msk [vmem:[#allocation0] sm:$0x1] %vm75_vm12, %v74_v27  }
  0x8c   :  { %v80_v28 = vpop.permute.xlu0 %79   ;;  %v86_v29 = vpop.permute.xlu1 %85  }
  0x8d   :  { %82 = vst.msk [vmem:[#allocation0] sm:$0x1] %vm81_vm13, %v80_v28  }
  0x8e   :  { %88 = vst.msk [vmem:[#allocation0] sm:$0x1] %vm87_vm14, %v86_v29  }
  0x90   :  { %v92_v30 = vpop.permute.xlu0 %91  }
  0x91   :  { %94 = vst.msk [vmem:[#allocation0] sm:$0x1] %vm93_vm15, %v92_v30  }
  0x98   :  { %v98_v31 = vld [vmem:[#allocation0] sm:$0x1] }
  0x99   :  { %100 = vst [vmem:[%s208_s1] sm:$0x1] %v98_v31 }

// kernel: basic_block_forward.5
= control target key start
LH: loop header
LB: loop body
LE: loop exit
PB: predicated region body
PF: predicated region fallthrough
CT: control target
= control target key end

     0   :  { %s320_s12 = smov 0   ;;  %s337_s0 = inlined_call_operand.vmem [shape: f32[64,128], index: 0, kind: input, shape index: {}]   ;;  %s338_s1 = inlined_call_operand.vmem [shape: f32[1,128], index: 1, kind: input, shape index: {}]   ;;  %s339_s2 = inlined_call_operand.vmem [shape: f32[1,128], index: 2, kind: input, shape index: {}]   ;;  %s340_s3 = inlined_call_operand.vmem [shape: bf16[64,128], index: 3, kind: output, shape index: {}]  }
   0x1 LB: > { %s262_s13 = sadd.s32 4294967295, %s298_s12   ;;  %p266_p0 = scmp.ge.s32.totalorder %s298_s12, 1  ;;  %s298_s12 = sphi %s320_s12, %s13_s12  }
   0x2   : > { %p138_p1 = scmp.lt.s32.totalorder %s298_s12, 5 }
   0x4   : > { %p139_p2 = pnand %p266_p0, %p138_p1 }
   0x5   : > { %s267_s14 = sshll.u32 (!%p139_p2), %s262_s13, 1  ;;  %v271_v0 = vld [vmem:[%s338_s1] ss:$0 sm:$0xff] (!%p139_p2) }
   0x6   : > { %142 = sbr.rel (%p139_p2) target bundleno = 26 (0x1a), region = 32  ;;  %p163_p3 = scmp.lt.s32.totalorder (!%p139_p2), %s267_s14, 7  ;;  %v272_v3 = vld [vmem:[%s339_s2] ss:$0 sm:$0xff] (!%p139_p2) }
   0xd   : > { %s342_s14 = smov (!%p163_p3, %s267_s14), 7 }
   0xe   : > { %s268_s15 = sshll.u32 %s342_s14, 3  ;;  %s270_s23 = sshll.u32 %s342_s14, 2 }
   0xf   : > { %s166_s20 = scalar_lea.vmem %s337_s0, %s268_s15  ;;  %s172_s26 = scalar_lea.vmem %s340_s3, %s270_s23 }
  0x10   : > { %v174_v1 = vld [vmem:[%s166_s20] sm:$0xff]  ;;  %v175_v2 = vld [vmem:[%s166_s20 + $0x8] sm:$0xff] }
  0x11   : > { %v183_v4 = vmul.f32 %v271_v0, %v174_v1  ;;  %v184_v5 = vmul.f32 %v271_v0, %v175_v2 }
  0x13   : > { %v192_v6 = vadd.f32 %v272_v3, %v183_v4  ;;  %v193_v7 = vadd.f32 %v272_v3, %v184_v5 }
  0x15   : > { %v194_v8 = vmax.f32 %v192_v6, 0.0  ;;  %v195_v9 = vmax.f32 %v193_v7, 0.0 }
  0x17   : > { %v282_v10 = vpack.c.bf16 %v195_v9, %v194_v8 }
  0x19   : > { %283 = vst [vmem:[%s172_s26] sm:$0xff] %v282_v10  }
  0x1a PF: > { %s13_s12 = sadd.s32 1, %s298_s12  }
  0x1b   : > { %p10_p4 = scmp.ge.s32.totalorder %s13_s12, 6  }
  0x1d   :  { %12 = sbr.rel (!%p10_p4) target bundleno = 1 (0x1), region = 62 }

// kernel: basic_block_forward.7
= control target key start
LH: loop header
LB: loop body
LE: loop exit
PB: predicated region body
PF: predicated region fallthrough
CT: control target
= control target key end

     0   :  { %s375_s15 = smov 0   ;;  %s401_s0 = inlined_call_operand.vmem [shape: f32[64,128], index: 0, kind: input, shape index: {}]   ;;  %s402_s1 = inlined_call_operand.vmem [shape: f32[1,128], index: 1, kind: input, shape index: {}]   ;;  %s403_s2 = inlined_call_operand.vmem [shape: f32[1,128], index: 2, kind: input, shape index: {}]   ;;  %s404_s3 = inlined_call_operand.vmem [shape: f32[64,128], index: 3, kind: input, shape index: {}]   ;;  %s405_s4 = inlined_call_operand.vmem [shape: f32[64,128], index: 4, kind: output, shape index: {}]  }
   0x1 LB: > { %s319_s16 = sadd.s32 4294967295, %s348_s15   ;;  %p323_p0 = scmp.ge.s32.totalorder %s348_s15, 1  ;;  %s348_s15 = sphi %s375_s15, %s14_s15  }
   0x2   : > { %p174_p1 = scmp.lt.s32.totalorder %s348_s15, 5 }
   0x4   : > { %p175_p2 = pnand %p323_p0, %p174_p1 }
   0x5   : > { %s324_s17 = sshll.u32 (!%p175_p2), %s319_s16, 1  ;;  %v330_v0 = vld [vmem:[%s402_s1] ss:$0 sm:$0xff] (!%p175_p2) }
   0x6   : > { %178 = sbr.rel (%p175_p2) target bundleno = 26 (0x1a), region = 36  ;;  %p206_p3 = scmp.lt.s32.totalorder (!%p175_p2), %s324_s17, 7  ;;  %v331_v3 = vld [vmem:[%s403_s2] ss:$0 sm:$0xff] (!%p175_p2) }
   0xd   : > { %s407_s17 = smov (!%p206_p3, %s324_s17), 7 }
   0xe   : > { %s325_s18 = sshll.u32 %s407_s17, 3 }
   0xf   : > { %s209_s23 = scalar_lea.vmem %s401_s0, %s325_s18  ;;  %s215_s26 = scalar_lea.vmem %s404_s3, %s325_s18 }
  0x10   : > { %v223_v1 = vld [vmem:[%s209_s23] sm:$0xff]  ;;  %v224_v2 = vld [vmem:[%s209_s23 + $0x8] sm:$0xff]  ;;  %s221_s5 = scalar_lea.vmem %s405_s4, %s325_s18 }
  0x11   : > { %v232_v4 = vmul.f32 %v330_v0, %v223_v1  ;;  %v233_v5 = vmul.f32 %v330_v0, %v224_v2  ;;  %v243_v6 = vld [vmem:[%s215_s26] sm:$0xff]  ;;  %v244_v7 = vld [vmem:[%s215_s26 + $0x8] sm:$0xff] }
  0x13   : > { %v241_v8 = vadd.f32 %v331_v3, %v232_v4  ;;  %v242_v9 = vadd.f32 %v331_v3, %v233_v5 }
  0x15   : > { %v245_v10 = vadd.f32 %v243_v6, %v241_v8  ;;  %v246_v11 = vadd.f32 %v244_v7, %v242_v9 }
  0x17   : > { %v247_v12 = vmax.f32 %v245_v10, 0.0  ;;  %v248_v13 = vmax.f32 %v246_v11, 0.0 }
  0x19   : > { %249 = vst [vmem:[%s221_s5] sm:$0xff] %v247_v12  ;;  %250 = vst [vmem:[%s221_s5 + $0x8] sm:$0xff] %v248_v13 }
  0x1a PF: > { %s14_s15 = sadd.s32 1, %s348_s15  }
  0x1b   : > { %p11_p4 = scmp.ge.s32.totalorder %s14_s15, 6  }
  0x1d   :  { %13 = sbr.rel (!%p11_p4) target bundleno = 1 (0x1), region = 69 }

</bundles_post_ra>
